<compile_context>
chip_gen: v7x
topology: tpu7x:2x2x1
jax: 0.10.0
libtpu: 0.0.40
codegen_flags: <defaults>
</compile_context>

<pallas_src>
import functools

import jax
import jax.numpy as jnp
from jax.experimental import pallas as pl
from jax.experimental.pallas import tpu as pltpu

_LANE = 128


def _bn_kernel(x_ref, g_ref, b_ref, o_ref, *, epsilon, batch):
    # x_ref: (B, TF), g_ref/b_ref: (1, TF), o_ref: (B, TF)
    x = x_ref[...].astype(jnp.float32)

    # Two-pass batch statistics (sublane reduction); x is already in VMEM so
    # this costs only VPU ops, which hide under the HBM DMA.
    m = jnp.sum(x, axis=0, keepdims=True) * jnp.float32(1.0 / batch)   # (1, TF)
    xc = x - m                                                         # (B, TF)
    sq = jnp.sum(xc * xc, axis=0, keepdims=True)                       # (1, TF)
    if batch > 1:
        # Unbiased variance (divisor N-1), matching torch.var default.
        v = sq * jnp.float32(1.0 / (batch - 1))
    else:
        # batch == 1: 0/0 -> nan, same as torch.var.
        v = sq / jnp.float32(batch - 1)

    inv_std = jnp.float32(1.0) / jnp.sqrt(v + jnp.float32(epsilon))    # (1, TF)

    scale = g_ref[...].astype(jnp.float32) * inv_std                   # (1, TF)
    y = xc * scale + b_ref[...].astype(jnp.float32)
    o_ref[...] = y.astype(o_ref.dtype)


def _round_up(x, m):
    return -(-x // m) * m


def _sublane_tile(itemsize):
    # Physical VMEM tiling is (8,128) for 32-bit, (16,128) for 16-bit,
    # (32,128) for 8-bit dtypes -> rows are padded up to this.
    return 8 * max(1, 4 // itemsize)


def _vmem_capacity_bytes():
    try:
        info = pltpu.get_tpu_info()
        cap = getattr(info, "vmem_capacity_bytes", None)
        if cap:
            return int(cap)
    except Exception:
        pass
    return 64 * 1024 * 1024  # conservative (v7x-sized) fallback


def _pick_feature_tile(batch, feat, itemsize, min_steps=4):
    """Pick a lane-multiple feature tile TF.

    Budgets the 4 double-buffered (B, TF) x/out windows against the chip's
    actual VMEM capacity, counting the *sublane-padded* batch.  Prefers a TF
    that divides F exactly (no host pad / slice, every store lane-dense) and
    at least `min_steps` grid steps so both v7x TensorCores get >= 2 blocks
    each (pipelined DMA per core).
    """
    b_eff = _round_up(batch, _sublane_tile(itemsize))
    vmem_cap = _vmem_capacity_bytes()
    # ~1/4 of VMEM for the four pipelined x/out windows; the rest is headroom
    # for gamma/beta windows, f32 kernel temporaries and Mosaic scratch.
    window_budget = vmem_cap // 4
    block_budget = max(b_eff * _LANE * itemsize, window_budget // 4)
    tf_cap = max(_LANE, (block_budget // (b_eff * itemsize)) // _LANE * _LANE)

    if feat % _LANE == 0:
        n_groups = feat // _LANE                          # 128-lane groups
        steps = max(pl.cdiv(feat, tf_cap), min(min_steps, n_groups))
        while n_groups % steps != 0:                      # exact divisor
            steps += 1
        return (n_groups // steps) * _LANE

    # F not lane-aligned: lane-multiple TF, partial (masked) last block.
    # Per-lane stats mean the out-of-range lanes only hold garbage that is
    # never written back in-bounds.
    steps = max(pl.cdiv(feat, tf_cap), min(min_steps, pl.cdiv(feat, _LANE)))
    return _round_up(pl.cdiv(feat, steps), _LANE)


def batch_norm_forward(x, gamma, beta, epsilon=1e-05):
    """x: (B, C, H, W) (or any (B, ...)); gamma/beta: (1, *x.shape[1:])."""
    B = x.shape[0]
    F = 1
    for s in x.shape[1:]:
        F *= s
    itemsize = jnp.dtype(x.dtype).itemsize

    TF = _pick_feature_tile(B, F, itemsize)
    grid = (pl.cdiv(F, TF),)

    # Row-major reshapes are free (no HBM copy), unlike the old pad/slice.
    x2 = x.reshape(B, F)
    g2 = gamma.reshape(1, F)
    b2 = beta.reshape(1, F)

    kernel = functools.partial(_bn_kernel, epsilon=epsilon, batch=B)

    vmem_cap = _vmem_capacity_bytes()
    vmem_limit = int(min(vmem_cap * 3 // 4, 100 * 1024 * 1024))

    cost = pl.CostEstimate(
        flops=7 * B * F,
        transcendentals=F,
        bytes_accessed=2 * B * F * itemsize + 3 * F * itemsize,
    )

    out2 = pl.pallas_call(
        kernel,
        out_shape=jax.ShapeDtypeStruct((B, F), x.dtype),
        grid_spec=pltpu.PrefetchScalarGridSpec(
            num_scalar_prefetch=0,
            grid=grid,
            in_specs=[
                pl.BlockSpec((B, TF), lambda j: (0, j)),
                pl.BlockSpec((1, TF), lambda j: (0, j)),
                pl.BlockSpec((1, TF), lambda j: (0, j)),
            ],
            out_specs=pl.BlockSpec((B, TF), lambda j: (0, j)),
        ),
        compiler_params=pltpu.CompilerParams(
            dimension_semantics=("parallel",),
            vmem_limit_bytes=vmem_limit,
        ),
        cost_estimate=cost,
    )(x2, g2, b2)

    return out2.reshape(x.shape)


if __name__ == "__main__":
    key = jax.random.PRNGKey(0)
    B, C, H, W = 2, 4, 16, 16
    x = jax.random.normal(key, (B, C, H, W), dtype=jnp.float32)

    # Deterministic parameter init, matching initialize_more_params():
    gamma = jnp.ones((1, C, H, W), dtype=jnp.float32)
    beta = jnp.zeros((1, C, H, W), dtype=jnp.float32)

    y = batch_norm_forward(x, gamma, beta, epsilon=1e-05)
    y = jax.block_until_ready(y)

    # Pure-JAX reference (two-pass, unbiased variance over batch dim).
    m_ref = jnp.mean(x, axis=0, keepdims=True)
    v_ref = jnp.sum((x - m_ref) ** 2, axis=0, keepdims=True) / (B - 1)
    y_ref = gamma * (x - m_ref) / jnp.sqrt(v_ref + 1e-05) + beta
    assert jnp.allclose(y, y_ref, atol=1e-5, rtol=1e-4), "mismatch vs reference"

    print("KERNEL_OK")
</pallas_src>

<mosaic_0001>
module attributes {stable_mosaic.version = 11 : i64} {
  func.func @_bn_kernel(%arg0: i32, %arg1: memref<2x256xf32, #tpu.memory_space<vmem>>, %arg2: memref<1x256xf32, #tpu.memory_space<vmem>>, %arg3: memref<1x256xf32, #tpu.memory_space<vmem>>, %arg4: memref<2x256xf32, #tpu.memory_space<vmem>>) attributes {dimension_semantics = [#tpu.dimension_semantics<parallel>], iteration_bounds = array<i64: 4>, scalar_prefetch = 0 : i64, scratch_operands = 0 : i64, tpu.core_type = #tpu.core_type<tc>, window_params = [{transform_indices = @transform_0, window_bounds = array<i64: 2, 256>}, {transform_indices = @transform_1, window_bounds = array<i64: 1, 256>}, {transform_indices = @transform_2, window_bounds = array<i64: 1, 256>}, {transform_indices = @transform_3, window_bounds = array<i64: 2, 256>}]} {
    %c0 = arith.constant 0 : index
    %c0_0 = arith.constant 0 : index
    %0 = vector.load %arg1[%c0, %c0_0] : memref<2x256xf32, #tpu.memory_space<vmem>>, vector<2x256xf32>
    %cst = arith.constant dense<0.000000e+00> : vector<256xf32>
    %1 = vector.multi_reduction <add>, %0, %cst [0] : vector<2x256xf32> to vector<256xf32>
    %2 = vector.shape_cast %1 : vector<256xf32> to vector<1x256xf32>
    %cst_1 = arith.constant 5.000000e-01 : f32
    %3 = vector.broadcast %cst_1 : f32 to vector<1x256xf32>
    %4 = arith.mulf %2, %3 : vector<1x256xf32>
    %5 = vector.broadcast %4 : vector<1x256xf32> to vector<2x256xf32>
    %6 = arith.subf %0, %5 : vector<2x256xf32>
    %7 = arith.mulf %6, %6 : vector<2x256xf32>
    %cst_2 = arith.constant dense<0.000000e+00> : vector<256xf32>
    %8 = vector.multi_reduction <add>, %7, %cst_2 [0] : vector<2x256xf32> to vector<256xf32>
    %9 = vector.shape_cast %8 : vector<256xf32> to vector<1x256xf32>
    %cst_3 = arith.constant 1.000000e+00 : f32
    %10 = vector.broadcast %cst_3 : f32 to vector<1x256xf32>
    %11 = arith.mulf %9, %10 : vector<1x256xf32>
    %cst_4 = arith.constant 9.99999974E-6 : f32
    %12 = vector.broadcast %cst_4 : f32 to vector<1x256xf32>
    %13 = arith.addf %11, %12 : vector<1x256xf32>
    %14 = math.sqrt %13 : vector<1x256xf32>
    %cst_5 = arith.constant 1.000000e+00 : f32
    %15 = vector.broadcast %cst_5 : f32 to vector<1x256xf32>
    %16 = arith.divf %15, %14 : vector<1x256xf32>
    %c0_6 = arith.constant 0 : index
    %c0_7 = arith.constant 0 : index
    %17 = vector.load %arg2[%c0_6, %c0_7] : memref<1x256xf32, #tpu.memory_space<vmem>>, vector<1x256xf32>
    %18 = arith.mulf %17, %16 : vector<1x256xf32>
    %19 = vector.broadcast %18 : vector<1x256xf32> to vector<2x256xf32>
    %20 = arith.mulf %6, %19 : vector<2x256xf32>
    %c0_8 = arith.constant 0 : index
    %c0_9 = arith.constant 0 : index
    %21 = vector.load %arg3[%c0_8, %c0_9] : memref<1x256xf32, #tpu.memory_space<vmem>>, vector<1x256xf32>
    %22 = vector.broadcast %21 : vector<1x256xf32> to vector<2x256xf32>
    %23 = arith.addf %20, %22 : vector<2x256xf32>
    %c0_10 = arith.constant 0 : index
    %c0_11 = arith.constant 0 : index
    %24 = vector.load %arg4[%c0_10, %c0_11] : memref<2x256xf32, #tpu.memory_space<vmem>>, vector<2x256xf32>
    tpu.vector_store %arg4[%c0_10, %c0_11], %23 {strides = array<i32>} : memref<2x256xf32, #tpu.memory_space<vmem>>, vector<2x256xf32>,
    return
  }
  func.func @transform_0(%arg0: i32) -> (i32, i32) {
    %c0_i32 = arith.constant 0 : i32
    %c0_i32_0 = arith.constant 0 : i32
    return %c0_i32, %arg0 : i32, i32
  }
  func.func @transform_1(%arg0: i32) -> (i32, i32) {
    %c0_i32 = arith.constant 0 : i32
    %c0_i32_0 = arith.constant 0 : i32
    return %c0_i32, %arg0 : i32, i32
  }
  func.func @transform_2(%arg0: i32) -> (i32, i32) {
    %c0_i32 = arith.constant 0 : i32
    %c0_i32_0 = arith.constant 0 : i32
    return %c0_i32, %arg0 : i32, i32
  }
  func.func @transform_3(%arg0: i32) -> (i32, i32) {
    %c0_i32 = arith.constant 0 : i32
    %c0_i32_0 = arith.constant 0 : i32
    return %c0_i32, %arg0 : i32, i32
  }
}

</mosaic_0001>

<bundles_post_ra>
// kernel: tpu_custom_call.1
= control target key start
LH: loop header
LB: loop body
LE: loop exit
PB: predicated region body
PF: predicated region fallthrough
CT: control target
= control target key end

     0   :  { %s1089_s0 = inlined_call_operand.hbm [shape: f32[2,1024], index: 0, kind: input, shape index: {}]   ;;  %s1090_s1 = inlined_call_operand.hbm [shape: f32[1,1024], index: 1, kind: input, shape index: {}]   ;;  %s1091_s2 = inlined_call_operand.hbm [shape: f32[1,1024], index: 2, kind: input, shape index: {}]   ;;  %s1092_s3 = inlined_call_operand.hbm [shape: f32[2,1024], index: 3, kind: output, shape index: {}]  }
   0x1   :  { %1096 = sst [smem:[#allocation13_spill]] %s1090_s1 }
   0x2   :  { %8 = vsyncpa [#allocation3], 0 }
   0x3   :  { %10 = vsyncpa [#allocation3 + $0x1], 0 }
   0x4   :  { %11 = vsyncpa [#allocation6], 0 }
   0x5   :  { %13 = vsyncpa [#allocation6 + $0x1], 0 }
   0x6   :  { %14 = vsyncpa [#allocation4], 0 }
   0x7   :  { %16 = vsyncpa [#allocation4 + $0x1], 0  ;;  %s819_s12 = smov 0   ;;  %s821_s13 = smov 0  }
   0x8   :  { %s823_s14 = smov 0   ;;  %s825_s15 = smov 0  }
   0x9 LB: > { %s840_s16 = sadd.s32 4294967295, %s791_s15   ;;  %s539_s17 = sadd.s32 4294967294, %s791_s15   ;;  %s791_s15 = sphi %s825_s15, %s1114_s15   ;;  %s787_s14 = sphi %s823_s14, %s1113_s14   ;;  %s783_s13 = sphi %s821_s13, %s1112_s13   ;;  %s779_s12 = sphi %s819_s12, %s1111_s12  }
   0xa   : > { %s844_s18 = sadd.s32 1, %s791_s15   ;;  %s29_s19 = sadd.s32 1, %s787_s14 }
   0xb   : > { %s26_s20 = ssub.s32 %s791_s15, %s844_s18  ;;  %p36_p0 = scmp.ne.s32.totalorder %s787_s14, %s783_s13 }
   0xc   : > { %p27_p1 = scmp.eq.s32.totalorder %s26_s20, 0  ;;  %p37_p2 = scmp.eq.s32.totalorder %s791_s15, 0 }
   0xd   : > { %p42_p3 = scmp.ne.s32.totalorder %s783_s13, %s779_s12  ;;  %p43_p4 = scmp.eq.s32.totalorder %s840_s16, 0 }
   0xe   : > { %s856_s21 = scalar_select %p27_p1, %s787_s14, %s29_s19  }
   0xf   : > { %p38_p5 = por %p37_p2, %p36_p0  ;;  %p858_p6 = por %p43_p4, %p42_p3 }
  0x10   : > { %1097 = sst [smem:[#allocation12_spill]] %s856_s21  ;;  %p118_p7 = scmp.eq.s32.totalorder %s840_s16, 3 }
  0x11   : > { %s1098_s22 = scalar_select %p858_p6, 1, 0 }
  0x12   : > { %p124_p8 = scmp.eq.s32.totalorder %s539_s17, 3  ;;  %p587_p9 = scmp.lt.s32.totalorder %s791_s15, 4 }
  0x13   : > { %p864_p10 = por %p118_p7, %p36_p0  ;;  %s873_s25 = sand.u32 1, %s787_s14  }
  0x14   : > { %p868_p11 = por %p124_p8, %p42_p3  ;;  %p875_p12 = pnand %p587_p9, %p38_p5 }
  0x15   : > { %s1099_s23 = scalar_select %p864_p10, 1, 0 }
  0x16   : > { %s1100_s24 = scalar_select %p868_p11, 1, 0 }
  0x17   : > { %s1101_s26 = scalar_select %p875_p12, 1, 0 }
  0x18   : > { %s163_s27 = sand.u32 1, %s791_s15   ;;  %s545_s28 = sshll.u32 %s873_s25, 1 }
  0x19   : > { %s562_s29 = sshll.u32 %s791_s15, 5  ;;  %s1102_s1 = sld [smem:[#allocation13_spill]] }
  0x1a   : > { %s167_s6 = scalar_lea.vmem [#allocation5], %s545_s28  ;;  %s893_s8 = scalar_lea.sflag [#allocation6], %s163_s27 }
  0x1b   : > { %s175_s7 = sshll.u32 %s167_s6, 4  ;;  %p899_p0 = pneg %p875_p12  ;;  %s891_s7 = int_to_ptr.vmem [resolvable:$true] %s175_s7 }
  0x1f   : > { %s887_s5 = scalar_lea.hbm %s1102_s1, %s562_s29  ;;  %s636_s19 = scalar_lea.hbm %s1102_s1, 128 }
  0x20   : > { %s631_s9 = scalar_lea.hbm %s887_s5, 32  ;;  %p637_p3 = scmp.lt.u32.totalorder %s887_s5, %s1102_s1 }
  0x21   : > { %p632_p13 = scmp.ne.s32.totalorder %s887_s5, %s631_s9  ;;  %p638_p4 = scmp.lt.u32.totalorder %s636_s19, %s631_s9 }
  0x22   : > { %p640_p7 = scmp.lt.u32.totalorder %s631_s9, %s887_s5 }
  0x23   : > { %p634_p1 = pnand %p899_p0, %p632_p13  ;;  %p639_p5 = por %p638_p4, %p637_p3 }
  0x25   : > { %p635_p2 = pneg %p634_p1  ;;  %p641_p8 = por %p640_p7, %p639_p5 }
  0x27   : > { %p642_p9 = pnand %p641_p8, %p635_p2 }
  0x29   : > { %645 = shalt.err (!%p642_p9)
}
  0x2a   : > { %s646_s27 = scalar_lea.vmem %s891_s7, 32  ;;  %s793_s4 = smov [#allocation5]  }
  0x2b   : > { %p647_p13 = scmp.ne.s32.totalorder %s891_s7, %s646_s27  ;;  %s651_s6 = sshll.u32 %s793_s4, 4  ;;  %s652_s6 = int_to_ptr.vmem [resolvable:$false] %s651_s6 }
  0x2c   : > { %s653_s11 = scalar_lea.vmem %s652_s6, 64  ;;  %p654_p10 = scmp.lt.s32.totalorder %s891_s7, %s652_s6 }
  0x2d   : > { %p649_p1 = pnand %p647_p13, %p899_p0  ;;  %p655_p6 = scmp.lt.s32.totalorder %s653_s11, %s646_s27 }
  0x2f   : > { %p650_p11 = pneg %p649_p1  ;;  %p656_p3 = por %p655_p6, %p654_p10 }
  0x31   : > { %p657_p4 = pnand %p656_p3, %p650_p11 }
  0x33   : > { %660 = shalt.err (!%p657_p4)
}
  0x34   : > { %579 = dma.hbm_to_vmem [thread:$0]  (!%p875_p12), %s887_s5, 32, %s891_s7, %s893_s8  }
  0x35   : > { %s928_s19 = scalar_lea.hbm %s1091_s2, %s562_s29  ;;  %p551_p6 = scmp.ge.s32.totalorder %s791_s15, 1 }
  0x36   : > { %p199_p10 = scmp.lt.s32.totalorder %s791_s15, 5  ;;  %s542_s20 = sshll.u32 %s873_s25, 2 }
  0x37   : > { %s561_s30 = sshll.u32 %s791_s15, 6  ;;  %s148_s5 = scalar_lea.vmem [#allocation2], %s542_s20 }
  0x38   : > { %p934_p11 = pnand %p551_p6, %p199_p10  ;;  %s941_s11 = scalar_lea.hbm %s1089_s0, %s561_s30 }
  0x39   : > { %s156_s29 = sshll.u32 %s148_s5, 4  ;;  %s947_s7 = scalar_lea.vmem [#allocation7], %s545_s28  ;;  %s943_s29 = int_to_ptr.vmem [resolvable:$true] %s156_s29 }
  0x3a   : > { %s1104_s27 = scalar_select %p934_p11, 1, 0 }
  0x3b   : > { %s194_s9 = sshll.u32 %s947_s7, 4  ;;  %s145_s17 = scalar_lea.sflag [#allocation3], %s873_s25  ;;  %s195_s9 = int_to_ptr.vmem [resolvable:$true] %s194_s9 }
  0x3c   : > { %s661_s1 = scalar_lea.hbm %s941_s11, 64  ;;  %s666_s6 = scalar_lea.hbm %s1089_s0, 256 }
  0x3d   : > { %p662_p2 = scmp.ne.s32.totalorder %s941_s11, %s661_s1  ;;  %p667_p8 = scmp.lt.u32.totalorder %s941_s11, %s1089_s0 }
  0x3e   : > { %p668_p9 = scmp.lt.u32.totalorder %s666_s6, %s661_s1  ;;  %p670_p1 = scmp.lt.u32.totalorder %s661_s1, %s941_s11 }
  0x3f   : > { %p664_p5 = pnand %p662_p2, %p899_p0 }
  0x40   : > { %p669_p13 = por %p668_p9, %p667_p8 }
  0x41   : > { %p665_p7 = pneg %p664_p5 }
  0x42   : > { %p671_p3 = por %p670_p1, %p669_p13 }
  0x44   : > { %p672_p4 = pnand %p671_p3, %p665_p7 }
  0x46   : > { %675 = shalt.err (!%p672_p4)
}
  0x47   : > { %s676_s25 = scalar_lea.vmem %s943_s29, 64  ;;  %s794_s28 = smov [#allocation2]  }
  0x48   : > { %p677_p6 = scmp.ne.s32.totalorder %s943_s29, %s676_s25  ;;  %s681_s5 = sshll.u32 %s794_s28, 4  ;;  %s682_s5 = int_to_ptr.vmem [resolvable:$false] %s681_s5 }
  0x49   : > { %s683_s21 = scalar_lea.vmem %s682_s5, 128  ;;  %p684_p5 = scmp.lt.s32.totalorder %s943_s29, %s682_s5 }
  0x4a   : > { %p679_p10 = pnand %p677_p6, %p899_p0  ;;  %p685_p11 = scmp.lt.s32.totalorder %s683_s21, %s676_s25 }
  0x4c   : > { %p680_p2 = pneg %p679_p10  ;;  %p686_p8 = por %p685_p11, %p684_p5 }
  0x4e   : > { %p687_p9 = pnand %p686_p8, %p680_p2 }
  0x50   : > { %690 = shalt.err (!%p687_p9)
}
  0x51   : > { %576 = dma.hbm_to_vmem [thread:$0]  (!%p875_p12), %s941_s11, 64, %s943_s29, %s145_s17  }
  0x52   : > { %s691_s1 = scalar_lea.hbm %s928_s19, 32  ;;  %s696_s6 = scalar_lea.hbm %s1091_s2, 128 }
  0x53   : > { %p692_p7 = scmp.ne.s32.totalorder %s928_s19, %s691_s1  ;;  %p697_p1 = scmp.lt.u32.totalorder %s928_s19, %s1091_s2 }
  0x54   : > { %p698_p3 = scmp.lt.u32.totalorder %s696_s6, %s691_s1  ;;  %p700_p6 = scmp.lt.u32.totalorder %s691_s1, %s928_s19 }
  0x55   : > { %p694_p13 = pnand %p692_p7, %p899_p0 }
  0x56   : > { %p699_p4 = por %p698_p3, %p697_p1 }
  0x57   : > { %p695_p11 = pneg %p694_p13 }
  0x58   : > { %p701_p10 = por %p700_p6, %p699_p4 }
  0x5a   : > { %p702_p2 = pnand %p701_p10, %p695_p11 }
  0x5c   : > { %705 = shalt.err (!%p702_p2)
}
  0x5d   : > { %s706_s11 = scalar_lea.vmem %s195_s9, 32  ;;  %s795_s29 = smov [#allocation7]  }
  0x5e   : > { %p707_p5 = scmp.ne.s32.totalorder %s195_s9, %s706_s11  ;;  %s711_s7 = sshll.u32 %s795_s29, 4  ;;  %s712_s7 = int_to_ptr.vmem [resolvable:$false] %s711_s7 }
  0x5f   : > { %s713_s17 = scalar_lea.vmem %s712_s7, 64  ;;  %p714_p7 = scmp.lt.s32.totalorder %s195_s9, %s712_s7 }
  0x60   : > { %p709_p8 = pnand %p707_p5, %p899_p0  ;;  %p715_p13 = scmp.lt.s32.totalorder %s713_s17, %s706_s11 }
  0x62   : > { %p710_p9 = pneg %p709_p8  ;;  %p716_p12 = por %p715_p13, %p714_p7 }
  0x64   : > { %p717_p1 = pnand %p716_p12, %p710_p9 }
  0x66   : > { %720 = shalt.err (!%p717_p1)
}
  0x67   : > { %p1105_p3 = scmp.ne.s32.totalorder %s1101_s26, 0  ;;  %p1106_p11 = scmp.ne.s32.totalorder %s1104_s27, 0 }
  0x68   : > { %s995_s10 = sand.u32 (!%p1106_p11), 1, %s783_s13   ;;  %p1107_p12 = scmp.ne.s32.totalorder (!%p1106_p11), %s1098_s22, 0 }
  0x69   : > { %582 = dma.hbm_to_vmem [thread:$0]  (!%p1105_p3), %s928_s19, 32, %s195_s9, %s893_s8  }
  0x6a   : > { %203 = sbr.rel (%p1106_p11) target bundleno = 228 (0xe4), region = 32  ;;  %s552_s28 = sshll.u32 (!%p1106_p11), %s995_s10, 2 }
  0x6b   : > { %s206_s5 = scalar_lea.sflag (!%p1106_p11), [#allocation3], %s995_s10  ;;  %s209_s21 = scalar_lea.vmem (!%p1106_p11), [#allocation2], %s552_s28 }
  0x71   : > { %766 = dma.done.wait (%p1107_p12), %s206_s5, 64  }
  0x72   : > { %768 = vsyncadd (%p1107_p12), %s206_s5, 4294967232  ;;  %s214_s26 = sand.u32 1, %s840_s16   ;;  %s553_s8 = sshll.u32 %s995_s10, 1 }
  0x73   : > { %s215_s19 = scalar_lea.sflag [#allocation6], %s214_s26  ;;  %s1009_s27 = scalar_lea.vmem [#allocation5], %s553_s8 }
  0x74   : > { %770 = dma.done.wait (%p1107_p12), %s215_s19, 64  }
  0x75   : > { %772 = vsyncadd (%p1107_p12), %s215_s19, 4294967232  ;;  %v269_v0 = vlaneseq  ;;  %v796_v1 = vmov 1983009808   ;;  %v264_v6 = vld [vmem:[%s209_s21] sm:$0xf]  ;;  %vm276_vm0 = vcmask 1041408  }
  0x76   : > { %v267_v2 = vunpack.c.l.s4 %v796_v1  ;;  %v797_v57 = vmov 1966171168   ;;  %s227_s22 = scalar_lea.vmem [#allocation7], %s553_s8  ;;  %s259_s9 = scalar_lea.vmem [#allocation8], %s552_s28 }
  0x77   : > { %v1015_v3 = vshrl.u32 %v269_v0, 7  ;;  %v356_v58 = vunpack.c.l.s4 %v797_v57  ;;  %v390_v0 = vld [vmem:[%s227_s22] sm:$0x3]  ;;  %s426_s1 = sshll.u32 %s259_s9, 4  ;;  %s564_s30 = sshll.u32 %s840_s16, 6  ;;  %s1043_s1 = int_to_ptr.vmem [resolvable:$true] %s426_s1 }
  0x78   : > { %v268_v4 = vunpack.c.0.s8 %v267_v2  ;;  %s1048_s20 = scalar_lea.hbm %s1092_s3, %s564_s30  ;;  %s412_s25 = scalar_lea.sflag [#allocation4], %s995_s10 }
  0x79   : > { %v357_v59 = vunpack.c.0.s8 %v356_v58  ;;  %v374_v2 = vsub.s32 0, %v1015_v3  ;;  %s721_s11 = scalar_lea.vmem %s1043_s1, 64  ;;  %p1108_p4 = scmp.ne.s32.totalorder %s1099_s23, 0 }
  0x7a   : > { %v1018_v5 = vsub.s32 %v268_v4, %v1015_v3  ;;  %v378_v4 = vsub.s32 1, %v1015_v3  ;;  %p722_p0 = scmp.ne.s32.totalorder %s1043_s1, %s721_s11  ;;  %s798_s16 = smov [#allocation8]  }
  0x7b   : > { %v360_v61 = vsub.s32 %v357_v59, %v1015_v3  ;;  %s725_s29 = sshll.u32 %s798_s16, 4  ;;  %s726_s29 = int_to_ptr.vmem [resolvable:$false] %s725_s29 }
  0x7c   : > { %v272_v7 = vrot.slane %v264_v6, %v1018_v5  ;;  %p723_p6 = pnand %p722_p0, %p1108_p4  ;;  %s727_s7 = scalar_lea.vmem %s726_s29, 128 }
  0x7d   : > { %p728_p2 = scmp.lt.s32.totalorder %s1043_s1, %s726_s29  ;;  %p729_p5 = scmp.lt.s32.totalorder %s727_s7, %s721_s11 }
  0x7e   : > { %v273_v8 = vcombine.high %v272_v7, %v272_v7  ;;  %v277_v9 = vsel %vm276_vm0, %v272_v7, 0.0  ;;  %p724_p10 = pneg %p723_p6 }
  0x7f   : > { %v278_v10 = vrot.slane %v277_v9, 4  ;;  %p730_p8 = por %p729_p5, %p728_p2 }
  0x80   : > { %v284_v11 = vsel %vm276_vm0, %v273_v8, 0.0  ;;  %v395_v8 = vrot.slane %v390_v0, %v374_v2 }
  0x81   : > { %v279_v12 = vadd.f32 %v278_v10, %v277_v9  ;;  %v285_v13 = vrot.slane %v284_v11, 4  ;;  %v399_v9 = vrot.slane %v390_v0, %v378_v4  ;;  %p731_p9 = pnand %p730_p8, %p724_p10 }
  0x83   : > { %v280_v14 = vrot.slane %v279_v12, 2  ;;  %v286_v15 = vadd.f32 %v285_v13, %v284_v11  ;;  %v400_v13 = vcombine.low %v395_v8, %v399_v9 }
  0x85   : > { %v281_v16 = vadd.f32 %v280_v14, %v279_v12  ;;  %v287_v17 = vrot.slane %v286_v15, 2 }
  0x87   : > { %v282_v18 = vrot.slane %v281_v16, 1  ;;  %v288_v19 = vadd.f32 %v287_v17, %v286_v15 }
  0x89   : > { %v283_v20 = vadd.f32 %v282_v18, %v281_v16  ;;  %v289_v21 = vrot.slane %v288_v19, 1  ;;  %v407_v16 = vrot.slane %v400_v13, %v1018_v5 }
  0x8b   : > { %v290_v22 = vadd.f32 %v289_v21, %v288_v19  ;;  %v291_v23 = vmul.f32 0.5, %v283_v20 }
  0x8d   : > { %v292_v24 = vmul.f32 0.5, %v290_v22 }
  0x8f   : > { %v295_v25 = vcombine.low %v291_v23, %v292_v24 }
  0x91   : > { %v302_v26 = vrot.slane %v295_v25, %v1018_v5 }
  0x93   : > { %v1024_v27 = vsub.f32 %v264_v6, %v302_v26  ;;  %v351_v6 = vld [vmem:[%s1009_s27] sm:$0x3] }
  0x95   : > { %v305_v28 = vmul.f32 %v1024_v27, %v1024_v27 }
  0x97   : > { %v313_v29 = vrot.slane %v305_v28, %v1018_v5 }
  0x99   : > { %v314_v30 = vcombine.high %v313_v29, %v313_v29  ;;  %v317_v31 = vsel %vm276_vm0, %v313_v29, 0.0 }
  0x9a   : > { %v318_v32 = vrot.slane %v317_v31, 4 }
  0x9b   : > { %v324_v33 = vsel %vm276_vm0, %v314_v30, 0.0 }
  0x9c   : > { %v319_v34 = vadd.f32 %v318_v32, %v317_v31  ;;  %v325_v35 = vrot.slane %v324_v33, 4 }
  0x9e   : > { %v320_v36 = vrot.slane %v319_v34, 2  ;;  %v326_v37 = vadd.f32 %v325_v35, %v324_v33 }
  0xa0   : > { %v321_v38 = vadd.f32 %v320_v36, %v319_v34  ;;  %v327_v39 = vrot.slane %v326_v37, 2 }
  0xa2   : > { %v322_v40 = vrot.slane %v321_v38, 1  ;;  %v328_v41 = vadd.f32 %v327_v39, %v326_v37 }
  0xa4   : > { %v323_v42 = vadd.f32 %v322_v40, %v321_v38  ;;  %v329_v43 = vrot.slane %v328_v41, 1 }
  0xa6   : > { %v330_v44 = vadd.f32 %v329_v43, %v328_v41  ;;  %v331_v45 = vadd.f32 1e-05, %v323_v42 }
  0xa8   : > { %v332_v46 = vadd.f32 1e-05, %v330_v44  ;;  %623 = vrsqrt.f32 %v331_v45  ;;  %vm335_vm1 = vcmp.eq.f32.partialorder %v331_v45, inf  ;;  %v338_v48 = vand.u32 2147483648, %v331_v45 }
  0xa9   : > { %vm337_vm2 = vcmp.eq.f32.partialorder %v331_v45, 0.0 }
  0xaa   : > { %625 = vrsqrt.f32 %v332_v46  ;;  %vm342_vm3 = vcmp.eq.f32.partialorder %v332_v46, inf  ;;  %v345_v51 = vand.u32 2147483648, %v332_v46  ;;  %vm344_vm4 = vcmp.eq.f32.partialorder %v332_v46, 0.0 }
  0xb2   : > { %v624_v47 = vpop.eup %623 }
  0xb3   : > { %v334_v49 = vmul.f32 %v624_v47, %v331_v45 }
  0xb4   : > { %v626_v50 = vpop.eup %625 }
  0xb5   : > { %v336_v52 = vsel %vm335_vm1, %v331_v45, %v334_v49  ;;  %v341_v53 = vmul.f32 %v626_v50, %v332_v46 }
  0xb6   : > { %v339_v54 = vsel %vm337_vm2, %v338_v48, %v336_v52 }
  0xb7   : > { %v343_v55 = vsel %vm342_vm3, %v332_v46, %v341_v53  ;;  %627 = vrcp.f32 %v339_v54 }
  0xb8   : > { %v346_v56 = vsel %vm344_vm4, %v345_v51, %v343_v55 }
  0xb9   : > { %629 = vrcp.f32 %v346_v56 }
  0xc1   : > { %v628_v60 = vpop.eup %627 }
  0xc3   : > { %v630_v62 = vpop.eup %629 }
  0xc4   : > { %v354_v63 = vcombine.low %v628_v60, %v630_v62 }
  0xc6   : > { %v361_v1 = vrot.slane %v354_v63, %v360_v61 }
  0xc8   : > { %v368_v7 = vrot.slane %v361_v1, %v360_v61 }
  0xca   : > { %v370_v10 = vmul.f32 %v368_v7, %v351_v6 }
  0xcc   : > { %v375_v11 = vrot.slane %v370_v10, %v374_v2  ;;  %v379_v12 = vrot.slane %v370_v10, %v378_v4 }
  0xce   : > { %v380_v14 = vcombine.low %v375_v11, %v379_v12 }
  0xd0   : > { %v387_v15 = vrot.slane %v380_v14, %v1018_v5 }
  0xd2   : > { %v389_v3 = vmul.f32 %v387_v15, %v1024_v27 }
  0xd4   : > { %v409_v17 = vadd.f32 %v407_v16, %v389_v3 }
  0xd6   : > { %410 = vst [vmem:[%s259_s9] sm:$0xf] %v409_v17 }
  0xd7   : > { %734 = shalt.err (!%p731_p9)
}
  0xd8   : > { %s735_s17 = scalar_lea.hbm %s1048_s20, 64  ;;  %s739_s5 = scalar_lea.hbm %s1092_s3, 256 }
  0xd9   : > { %p736_p7 = scmp.ne.s32.totalorder %s1048_s20, %s735_s17  ;;  %p740_p3 = scmp.lt.u32.totalorder %s1048_s20, %s1092_s3 }
  0xda   : > { %p741_p11 = scmp.lt.u32.totalorder %s739_s5, %s735_s17  ;;  %p743_p0 = scmp.lt.u32.totalorder %s735_s17, %s1048_s20 }
  0xdb   : > { %p737_p13 = pnand %p736_p7, %p1108_p4 }
  0xdc   : > { %p742_p12 = por %p741_p11, %p740_p3 }
  0xdd   : > { %p738_p1 = pneg %p737_p13 }
  0xde   : > { %p744_p6 = por %p743_p0, %p742_p12 }
  0xe0   : > { %p745_p10 = pnand %p744_p6, %p738_p1 }
  0xe2   : > { %748 = shalt.err (!%p745_p10)
}
  0xe3   : > { %571 = dma.vmem_to_hbm [thread:$0]  (%p1108_p4), %s1043_s1, 64, %s1048_s20, %s412_s25  }
  0xe4 PF: > { %p588_p2 = scmp.ge.s32.totalorder %s791_s15, 2  ;;  %s438_s8 = sand.u32 1, %s779_s12  }
  0xe5   : > { %p1109_p5 = scmp.ne.s32.totalorder %s1100_s24, 0  ;;  %s439_s19 = scalar_lea.sflag [#allocation4], %s438_s8 }
  0xe7   : > { %p584_p8 = pnand %p588_p2, %p1109_p5 }
  0xe9   : > { %774 = dma.done.wait (!%p584_p8), %s439_s19, 64  }
  0xea   : > { %776 = vsyncadd (!%p584_p8), %s439_s19, 4294967232  ;;  %s1110_s27 = sld [smem:[#allocation12_spill]]  ;;  %p19_p9 = scmp.ge.s32.totalorder %s844_s18, 6  }
  0xeb   : > { %s1111_s12 = smov %s783_s13  ;;  %s1112_s13 = smov %s787_s14 }
  0xec   : > { %s1114_s15 = smov %s844_s18  ;;  %21 = sbr.rel (!%p19_p9) target bundleno = 9 (0x9), region = 101 }
  0xf0   : > { %s1113_s14 = smov %s1110_s27 }
  0xf3   :  { %444 = vsyncpa [#allocation3], 1 }
  0xf4   :  { %446 = vsyncpa [#allocation3 + $0x1], 1 }
  0xf5   :  { %447 = vsyncpa [#allocation6], 1 }
  0xf6   :  { %449 = vsyncpa [#allocation6 + $0x1], 1 }
  0xf7   :  { %450 = vsyncpa [#allocation4], 1 }
  0xf8   :  { %452 = vsyncpa [#allocation4 + $0x1], 1 }

</bundles_post_ra>
